<compile_context>
chip_gen: v7x
topology: tpu7x:2x2x1
jax: 0.10.0
libtpu: 0.0.40
codegen_flags: <defaults>
</compile_context>

<pallas_src>
import jax
import jax.numpy as jnp
from jax import lax
from jax.experimental import pallas as pl
from jax.experimental.pallas import tpu as pltpu


NUM_EMB, EMB_DIM, HIDDEN, OUT_DIM = 10, 8, 16, 8
JK = (1, 2)  # jumping-knowledge indices into `xs` (xs[1]=GCN1 out, xs[2]=GCN2 out)


# ---------------------------- fused Pallas kernel ----------------------------

def _fused_forward_kernel(ids_ref, adj_ref, pmat_ref, emb_w1_ref, w2_ref,
                          wp_ref, out_ref):
    n = ids_ref.shape[0]

    # ---- layers 0+1 fused: Embedding folded into GCN1.
    #   x0 = onehot @ emb ; h1 = x0 @ W1  ==  onehot @ (emb @ W1) = onehot @ emb_w1
    ids = ids_ref[...]                                          # (N, 1) int32
    cols = lax.broadcasted_iota(jnp.int32, (n, NUM_EMB), 1)     # (N, NUM_EMB)
    onehot = (cols == ids).astype(jnp.float32)

    adj = adj_ref[...]                                          # (N, N) A[dst, src]

    h1 = jnp.dot(onehot, emb_w1_ref[...], preferred_element_type=jnp.float32)
    x1 = jnp.maximum(jnp.dot(adj, h1, preferred_element_type=jnp.float32), 0.0)

    # ---- layer 2: GCNConv(16->16, normalize=False, bias=False) + tanh
    h2 = jnp.dot(x1, w2_ref[...], preferred_element_type=jnp.float32)
    x2 = jnp.tanh(jnp.dot(adj, h2, preferred_element_type=jnp.float32))

    # ---- layer 3: GlobalPooling (SUM aggregation, JK=[1,2], sigmoid), fused:
    #   [P@x1 | P@x2] @ [[Wp0],[Wp1]]  ==  (P@x1)@Wp0 + (P@x2)@Wp1
    xcat = jnp.concatenate([x1, x2], axis=1)                    # (N, 2*HIDDEN)
    pooled = jnp.dot(pmat_ref[...], xcat, preferred_element_type=jnp.float32)
    y = jnp.dot(pooled, wp_ref[...], preferred_element_type=jnp.float32)
    out_ref[...] = jax.nn.sigmoid(y).astype(out_ref.dtype)


def fused_forward(node_ids, adj, pool_mat, emb_w1, w_gcn2, wp_cat):
    """Single gridless pallas_call running the whole NeuraLogic forward."""
    N = adj.shape[0]
    G = pool_mat.shape[0]
    ids2d = node_ids.reshape(N, 1).astype(jnp.int32)

    vmem = pl.BlockSpec(memory_space=pltpu.MemorySpace.VMEM)
    return pl.pallas_call(
        _fused_forward_kernel,
        out_shape=jax.ShapeDtypeStruct((G, OUT_DIM), jnp.float32),
        in_specs=[vmem] * 6,        # ids, adj, pmat, emb_w1, w2, wp_cat
        out_specs=vmem,
    )(ids2d, adj, pool_mat, emb_w1, w_gcn2, wp_cat)


# --------------------- NeuraLogic forward (Pallas-backed) ---------------------

class NeuraLogicPallas:
    def __init__(self, key):
        k0, k1, k2, k3, k4 = jax.random.split(key, 5)
        s = 0.2
        self.emb_table = s * jax.random.normal(k0, (NUM_EMB, EMB_DIM), jnp.float32)
        self.w_gcn1 = s * jax.random.normal(k1, (EMB_DIM, HIDDEN), jnp.float32)
        self.w_gcn2 = s * jax.random.normal(k2, (HIDDEN, HIDDEN), jnp.float32)
        self.w_pool = jnp.stack([
            s * jax.random.normal(k3, (HIDDEN, OUT_DIM), jnp.float32),
            s * jax.random.normal(k4, (HIDDEN, OUT_DIM), jnp.float32),
        ])  # (len(JK), HIDDEN, OUT_DIM)

        # Kernel-side fused operands (exact algebraic refactors of the params).
        emb_w1 = self.emb_table @ self.w_gcn1                      # (NUM_EMB, HIDDEN)
        wp_cat = jnp.concatenate([self.w_pool[0], self.w_pool[1]], axis=0)  # (2H, OUT)
        w2 = self.w_gcn2

        def _forward(node_ids, edge_index, batch, *, num_graphs):
            # Glue (plain JAX under the same jit): densify graph structure with
            # MXU matmuls, not scatters.
            N = node_ids.shape[0]
            src, dst = edge_index[0], edge_index[1]
            adj = jnp.dot(jax.nn.one_hot(dst, N, dtype=jnp.float32).T,
                          jax.nn.one_hot(src, N, dtype=jnp.float32))   # A[dst, src]
            pool_mat = jax.nn.one_hot(batch, num_graphs, dtype=jnp.float32).T  # (G, N)
            return fused_forward(node_ids, adj, pool_mat, emb_w1, w2, wp_cat)

        # num_graphs is static -> whole forward (glue + fused kernel) compiles once.
        self._forward = jax.jit(_forward, static_argnames=("num_graphs",))

    def __call__(self, node_ids, edge_index, batch, num_graphs):
        return self._forward(node_ids, edge_index, batch, num_graphs=num_graphs)


def reference_forward(model, node_ids, edge_index, batch, num_graphs):
    """Pure-JAX reference mirroring the PyTorch semantics (unfused params)."""
    N = node_ids.shape[0]
    src, dst = edge_index[0], edge_index[1]
    adj = jnp.zeros((N, N), jnp.float32).at[dst, src].add(1.0)
    pool_mat = jax.nn.one_hot(batch, num_graphs, dtype=jnp.float32).T

    x = model.emb_table[node_ids]                                   # Embedding
    xs = [x]
    x = jnp.maximum(adj @ (x @ model.w_gcn1), 0.0)                  # GCNConv + ReLU
    xs.append(x)
    x = jnp.tanh(adj @ (x @ model.w_gcn2))                          # GCNConv + tanh
    xs.append(x)
    pooled = [(pool_mat @ xs[j]) @ model.w_pool[i] for i, j in enumerate(JK)]
    x = jax.nn.sigmoid(sum(pooled))                                 # GlobalPooling(SUM) + sigmoid
    return x


if __name__ == "__main__":
    key = jax.random.PRNGKey(0)
    model = NeuraLogicPallas(key)

    N = 16
    node_ids = jnp.arange(N, dtype=jnp.int32) % NUM_EMB
    # Two graphs of 8 nodes each; bidirectional ring edges within each graph.
    src, dst = [], []
    for g in range(2):
        base = 8 * g
        for i in range(8):
            a, b = base + i, base + (i + 1) % 8
            src += [a, b]
            dst += [b, a]
    edge_index = jnp.array([src, dst], dtype=jnp.int32)     # (2, 32)
    batch = jnp.repeat(jnp.arange(2, dtype=jnp.int32), 8)   # (16,)
    num_graphs = 2                                           # static

    out = model(node_ids, edge_index, batch, num_graphs)
    out = jax.block_until_ready(out)

    ref = reference_forward(model, node_ids, edge_index, batch, num_graphs)
    assert out.shape == (num_graphs, OUT_DIM), out.shape
    assert jnp.allclose(out, ref, atol=2e-3, rtol=2e-3), (out, ref)
    print("KERNEL_OK")
</pallas_src>

<mosaic_0001>
module attributes {stable_mosaic.version = 11 : i64} {
  func.func @_fused_forward_kernel(%arg0: memref<16x1xi32, #tpu.memory_space<vmem>>, %arg1: memref<16x16xf32, #tpu.memory_space<vmem>>, %arg2: memref<2x16xf32, #tpu.memory_space<vmem>>, %arg3: memref<10x16xf32, #tpu.memory_space<vmem>>, %arg4: memref<16x16xf32, #tpu.memory_space<vmem>>, %arg5: memref<32x8xf32, #tpu.memory_space<vmem>>, %arg6: memref<2x8xf32, #tpu.memory_space<vmem>>) attributes {dimension_semantics = [], scalar_prefetch = 0 : i64, scratch_operands = 0 : i64, tpu.core_type = #tpu.core_type<tc>} {
    %c0 = arith.constant 0 : index
    %c0_0 = arith.constant 0 : index
    %0 = vector.load %arg0[%c0, %c0_0] : memref<16x1xi32, #tpu.memory_space<vmem>>, vector<16x1xi32>
    %1 = tpu.iota {dimensions = array<i32: 1>} : vector<16x10xi32>
    %2 = vector.broadcast %0 : vector<16x1xi32> to vector<16x10xi32>
    %3 = arith.cmpi eq, %1, %2 : vector<16x10xi32>
    %4 = arith.extui %3 : vector<16x10xi1> to vector<16x10xi32>
    %5 = arith.sitofp %4 : vector<16x10xi32> to vector<16x10xf32>
    %c0_1 = arith.constant 0 : index
    %c0_2 = arith.constant 0 : index
    %6 = vector.load %arg1[%c0_1, %c0_2] : memref<16x16xf32, #tpu.memory_space<vmem>>, vector<16x16xf32>
    %c0_3 = arith.constant 0 : index
    %c0_4 = arith.constant 0 : index
    %7 = vector.load %arg3[%c0_3, %c0_4] : memref<10x16xf32, #tpu.memory_space<vmem>>, vector<10x16xf32>
    %cst = arith.constant dense<0.000000e+00> : vector<16x16xf32>
    %8 = tpu.matmul %5, %7, %cst {dimension_numbers = #tpu.dot_dimension_numbers<[1], [0], [0], [1], [0, 0, 1, 1], [], []>} : vector<16x10xf32>, vector<10x16xf32>, vector<16x16xf32> -> vector<16x16xf32>
    %cst_5 = arith.constant dense<0.000000e+00> : vector<16x16xf32>
    %9 = tpu.matmul %6, %8, %cst_5 {dimension_numbers = #tpu.dot_dimension_numbers<[1], [0], [0], [1], [0, 0, 1, 1], [], []>} : vector<16x16xf32>, vector<16x16xf32>, vector<16x16xf32> -> vector<16x16xf32>
    %cst_6 = arith.constant 0.000000e+00 : f32
    %10 = vector.broadcast %cst_6 : f32 to vector<16x16xf32>
    %11 = arith.maximumf %9, %10 : vector<16x16xf32>
    %c0_7 = arith.constant 0 : index
    %c0_8 = arith.constant 0 : index
    %12 = vector.load %arg4[%c0_7, %c0_8] : memref<16x16xf32, #tpu.memory_space<vmem>>, vector<16x16xf32>
    %cst_9 = arith.constant dense<0.000000e+00> : vector<16x16xf32>
    %13 = tpu.matmul %11, %12, %cst_9 {dimension_numbers = #tpu.dot_dimension_numbers<[1], [0], [0], [1], [0, 0, 1, 1], [], []>} : vector<16x16xf32>, vector<16x16xf32>, vector<16x16xf32> -> vector<16x16xf32>
    %cst_10 = arith.constant dense<0.000000e+00> : vector<16x16xf32>
    %14 = tpu.matmul %6, %13, %cst_10 {dimension_numbers = #tpu.dot_dimension_numbers<[1], [0], [0], [1], [0, 0, 1, 1], [], []>} : vector<16x16xf32>, vector<16x16xf32>, vector<16x16xf32> -> vector<16x16xf32>
    %15 = math.tanh %14 : vector<16x16xf32>
    %16 = tpu.concatenate %11, %15 in 1 : vector<16x16xf32>, vector<16x16xf32> -> vector<16x32xf32>
    %c0_11 = arith.constant 0 : index
    %c0_12 = arith.constant 0 : index
    %17 = vector.load %arg2[%c0_11, %c0_12] : memref<2x16xf32, #tpu.memory_space<vmem>>, vector<2x16xf32>
    %cst_13 = arith.constant dense<0.000000e+00> : vector<2x32xf32>
    %18 = tpu.matmul %17, %16, %cst_13 {dimension_numbers = #tpu.dot_dimension_numbers<[1], [0], [0], [1], [0, 0, 1, 1], [], []>} : vector<2x16xf32>, vector<16x32xf32>, vector<2x32xf32> -> vector<2x32xf32>
    %c0_14 = arith.constant 0 : index
    %c0_15 = arith.constant 0 : index
    %19 = vector.load %arg5[%c0_14, %c0_15] : memref<32x8xf32, #tpu.memory_space<vmem>>, vector<32x8xf32>
    %cst_16 = arith.constant dense<0.000000e+00> : vector<2x8xf32>
    %20 = tpu.matmul %18, %19, %cst_16 {dimension_numbers = #tpu.dot_dimension_numbers<[1], [0], [0], [1], [0, 0, 1, 1], [], []>} : vector<2x32xf32>, vector<32x8xf32>, vector<2x8xf32> -> vector<2x8xf32>
    %21 = arith.negf %20 : vector<2x8xf32>
    %22 = math.exp %21 : vector<2x8xf32>
    %cst_17 = arith.constant 1.000000e+00 : f32
    %23 = vector.broadcast %cst_17 : f32 to vector<2x8xf32>
    %24 = arith.addf %23, %22 : vector<2x8xf32>
    %25 = arith.divf %23, %24 : vector<2x8xf32>
    %c0_18 = arith.constant 0 : index
    %c0_19 = arith.constant 0 : index
    %26 = vector.load %arg6[%c0_18, %c0_19] : memref<2x8xf32, #tpu.memory_space<vmem>>, vector<2x8xf32>
    tpu.vector_store %arg6[%c0_18, %c0_19], %25 {strides = array<i32>} : memref<2x8xf32, #tpu.memory_space<vmem>>, vector<2x8xf32>,
    return
  }
}

</mosaic_0001>

<bundles_post_ra>
// kernel: _forward.1
= control target key start
LH: loop header
LB: loop body
LE: loop exit
PB: predicated region body
PF: predicated region fallthrough
CT: control target
= control target key end

     0   :  { %s816_s0 = inlined_call_operand.vmem [shape: s32[16,1], index: 0, kind: input, shape index: {}]   ;;  %s817_s1 = inlined_call_operand.vmem [shape: f32[16,16], index: 1, kind: input, shape index: {}]   ;;  %s818_s2 = inlined_call_operand.vmem [shape: f32[2,16], index: 2, kind: input, shape index: {}]   ;;  %s819_s3 = inlined_call_operand.vmem [shape: f32[10,16], index: 3, kind: input, shape index: {}]   ;;  %s820_s4 = inlined_call_operand.vmem [shape: f32[16,16], index: 4, kind: input, shape index: {}]   ;;  %s821_s5 = inlined_call_operand.vmem [shape: f32[32,8], index: 5, kind: input, shape index: {}]   ;;  %s822_s6 = inlined_call_operand.hbm [shape: f32[2,8], index: 6, kind: output, shape index: {}]  }
   0x1   :  { %v24_v0 = vld [vmem:[%s816_s0] sm:$0xff] }
   0x2   :  { %11 = vsyncpa [#allocation3], 0  ;;  %v714_v1 = vmov 0   ;;  %v42_v2 = vld [vmem:[%s819_s3] sm:$0xff]  ;;  %v43_v3 = vld [vmem:[%s819_s3 + $0x8] sm:$0x3]  ;;  %v26_v6 = vlaneseq }
   0x3   :  { %676 = vset.pattern.permute.xlu0 %v714_v1  ;;  %vm51_vm0 = vcmask 1041408   ;;  %v642_v4 = vpack.c.bf16 %v43_v3, %v42_v2  ;;  %v25_v5 = vld [vmem:[%s816_s0 + $0x8] sm:$0xff]  ;;  %vm715_vm1 = vmmov 1   ;;  %vm44_vm3 = vcmask 80896   ;;  %v40_v13 = vld [vmem:[%s817_s1] sm:$0xff]  ;;  %v460_v33 = vld [vmem:[%s821_s5 + $0x10] sm:$0xff] }
   0x4   :  { %29 = vperm.xlu0 %676, %v24_v0   ;;  %vm643_vm2 = vmpackc.low %vm51_vm0, %vm715_vm1  ;;  %v27_v7 = vand.u32 127, %v26_v6  ;;  %v716_v9 = vmov 0.0   ;;  %vm130_vm6 = vcmask 130048   ;;  %v41_v17 = vld [vmem:[%s817_s1 + $0x8] sm:$0xff]  ;;  %v214_v18 = vld [vmem:[%s820_s4] sm:$0xff]  ;;  %v717_v30 = vmov 0.0|0.0  }
   0x5   :  { %644 = vmatprep.subr.msk.bf16.mxu0 %vm643_vm2, %v642_v4  ;;  %607 = vmatprep.mubr.msk.f32.mxu1 %vm130_vm6, %v40_v13  ;;  %v215_v19 = vld [vmem:[%s820_s4 + $0x8] sm:$0xff]  ;;  %vm718_vm7 = vmmov 0   ;;  %v458_v31 = vld [vmem:[%s821_s5] sm:$0xff]  ;;  %v461_v36 = vld [vmem:[%s821_s5 + $0x18] sm:$0xff]  ;;  %s719_s17 = smov 16   ;;  %vm462_vm8 = vcmask 261120  }
   0x6   :  { %647 = vmatpush3.bf16.msk.msra.mxu0 %vm643_vm2, %v642_v4  ;;  %v652_v20 = vpack.c.bf16 %v215_v19, %v214_v18  ;;  %v459_v32 = vld [vmem:[%s821_s5 + $0x8] sm:$0xff]  ;;  %v667_v39 = vpack.c.bf16 %v461_v36, %v460_v33  ;;  %v384_v46 = vld [vmem:[%s818_s2] sm:$0x3]  ;;  %s720_s5 = smov [#allocation2]   ;;  %vm542_vm9 = vcmask 58368  }
   0x7   :  { %v664_v35 = vpack.c.bf16 %v459_v32, %v458_v31  ;;  %s550_s20 = sshll.u32 %s720_s5, 4  ;;  %s551_s20 = int_to_ptr.vmem [resolvable:$true] %s550_s20 }
   0x8   :  { %32 = vperm.xlu0 %676, %v25_v5   ;;  %653 = vmatprep.subr.bf16.mxu0 %v652_v20  ;;  %s690_s2 = scalar_lea.vmem %s551_s20, 32  ;;  %p695_p1 = scmp.lt.s32.totalorder %s551_s20, %s551_s20 }
   0x9   :  { %p691_p0 = scmp.ne.s32.totalorder %s551_s20, %s690_s2  ;;  %p696_p2 = scmp.lt.s32.totalorder %s690_s2, %s690_s2 }
   0xb   :  { %p697_p3 = por %p696_p2, %p695_p1 }
   0xd   :  { %p698_p4 = pnand %p697_p3, %p691_p0 }
  0x83   :  { %v30_v8 = vpop.permute.xlu0 %29 }
  0x84   :  { %vm34_vm4 = vcmp.eq.s32.totalorder %v27_v7, %v30_v8 }
  0x85   :  { %v558_v10 = vsel %vm34_vm4, 1.0, %v716_v9 }
  0x86   :  { %600 = vmatprep.mubr.msk.f32.mxu0 %vm44_vm3, %v558_v10 }
  0x87   :  { %v33_v11 = vpop.permute.xlu0 %32 }
  0x88   :  { %vm35_vm5 = vcmp.eq.s32.totalorder %v27_v7, %v33_v11 }
  0x89   :  { %v559_v12 = vsel %vm35_vm5, 1.0, %v716_v9 }
  0x8a   :  { %601 = vmatmul.mubr.msk.f32.vlgmr.msra.gmra.mrb[0].mxu0 %vm44_vm3, %v559_v12 }
  0x8b   :  { %655 = vmatpush3.bf16.msra.mxu0 %v652_v20 }
  0x8c   :  { %660 = vmatprep.subr.bf16.mxu0 %v717_v30 }
 0x15d   :  { %v602_v14 = vpop.f32.mrb[0].mxu0 }
 0x15e   :  { %v121_v15 = vpop.f32.mrb[1].mxu0 }
 0x15f   :  { %v648_v16 = vpack.c.bf16 %v602_v14, %v121_v15 }
 0x161   :  { %649 = vmatprep.subr.bf16.mxu1 %v648_v16 }
 0x162   :  { %651 = vmatpush3.bf16.msra.mxu1 %v648_v16 }
 0x165   :  { %608 = vmatmul.mubr.msk.f32.vlgmr.msra.gmra.mrb[0].mxu1 %vm130_vm6, %v41_v17 }
 0x166   :  { %621 = vmatprep.mubr.msk.f32.mxu1 %vm130_vm6, %v40_v13 }
 0x238   :  { %v609_v21 = vpop.f32.mrb[0].mxu1 }
 0x239   :  { %v203_v22 = vpop.f32.mrb[1].mxu1  ;;  %v213_v24 = vmax.f32 %v609_v21, 0.0 }
 0x23a   :  { %v212_v23 = vmax.f32 %v203_v22, 0.0 }
 0x23c   :  { %614 = vmatprep.mubr.msk.f32.mxu0 %vm130_vm6, %v212_v23 }
 0x23d   :  { %615 = vmatmul.mubr.msk.f32.vlgmr.msra.gmra.mrb[2].mxu0 %vm130_vm6, %v213_v24 }
 0x23e   :  { %628 = vmatprep.mubr.msk.f32.mxu0 %vm718_vm7, %v716_v9 }
 0x310   :  { %v616_v25 = vpop.f32.mrb[2].mxu0 }
 0x311   :  { %v288_v26 = vpop.f32.mrb[3].mxu0 }
 0x312   :  { %v656_v27 = vpack.c.bf16 %v616_v25, %v288_v26 }
 0x314   :  { %657 = vmatprep.subr.bf16.mxu1 %v656_v27 }
 0x315   :  { %659 = vmatpush3.bf16.msra.mxu1 %v656_v27 }
 0x316   :  { %663 = vmatprep.subr.bf16.mxu1 %v717_v30 }
 0x318   :  { %622 = vmatmul.mubr.msk.f32.vlgmr.msra.gmra.mrb[2].mxu1 %vm130_vm6, %v41_v17 }
 0x319   :  { %639 = vmatprep.mubr.msk.f32.mxu1 %vm718_vm7, %v716_v9  ;;  %665 = vmatpush3.bf16.msra.mxu1 %v664_v35 }
 0x31a   :  { %666 = vmatprep.subr.bf16.mxu1 %v717_v30 }
 0x31d   :  { %668 = vmatpush3.bf16.msra.mxu1 %v667_v39 }
 0x3eb   :  { %v623_v28 = vpop.f32.mrb[2].mxu1 }
 0x3ec   :  { %682 = vtanh.f32 %v623_v28  ;;  %v363_v29 = vpop.f32.mrb[3].mxu1 }
 0x3ed   :  { %684 = vtanh.f32 %v363_v29 }
 0x3f6   :  { %v683_v34 = vpop.eup %682 }
 0x3f7   :  { %v685_v37 = vpop.eup %684 }
 0x3f8   :  { %v677_v38 = vpack.i.bf16 %v683_v34, %v685_v37 }
 0x3fa   :  { %678 = vrot.lane.b32.xlu1 %v677_v38, %s719_s17 }
 0x46c   :  { %v679_v40 = vpop.permute.xlu1 %678 }
 0x46d   :  { %v681_v41 = vunpack.i.h.bf16 %v679_v40  ;;  %v680_v42 = vunpack.i.l.bf16 %v679_v40 }
 0x46f   :  { %v383_v43 = vsel %vm130_vm6, %v213_v24, %v681_v41  ;;  %v382_v44 = vsel %vm130_vm6, %v212_v23, %v680_v42 }
 0x470   :  { %v661_v45 = vpack.c.bf16 %v383_v43, %v382_v44 }
 0x472   :  { %662 = vmatpush3.bf16.msra.mxu0 %v661_v45 }
 0x475   :  { %629 = vmatmul.mubr.msk.f32.vlgmr.msra.gmra.mrb[4].mxu0 %vm130_vm6, %v384_v46 }
 0x548   :  { %v454_v47 = vpop.f32.mrb[4].mxu0 }
 0x549   :  { %v630_v48 = vpop.f32.mrb[5].mxu0  ;;  %640 = vmatmul.mubr.msk.f32.vlgmr.msra.gmra.mrb[4].mxu1 %vm462_vm8, %v454_v47 }
 0x61c   :  { %v532_v49 = vpop.f32.mrb[4].mxu1 }
 0x61d   :  { %v571_v50 = vmul.f32 -1.442695, %v532_v49  ;;  %v641_v51 = vpop.f32.mrb[5].mxu1 }
 0x61f   :  { %686 = vpow2.f32 %v571_v50 }
 0x629   :  { %v687_v52 = vpop.eup %686 }
 0x62a   :  { %v539_v53 = vadd.f32 1.0, %v687_v52 }
 0x62c   :  { %688 = vrcp.f32 %v539_v53 }
 0x636   :  { %v689_v54 = vpop.eup %688 }
 0x637   :  { %543 = vst.msk [vmem:[#allocation2] sm:$0x3] %vm542_vm9, %v689_v54 }
 0x638   :  { %701 = shalt.err (!%p698_p4)
}
 0x639   :  { %s702_s23 = scalar_lea.hbm %s822_s6, 32 }
 0x63a   :  { %p703_p5 = scmp.ne.s32.totalorder %s822_s6, %s702_s23  ;;  %p706_p6 = scmp.lt.u32.totalorder %s702_s23, %s822_s6 }
 0x63c   :  { %p708_p7 = pnand %p706_p6, %p703_p5 }
 0x63e   :  { %711 = shalt.err (!%p708_p7)
}
 0x63f   :  { %553 = dma.vmem_to_hbm [thread:$0]  %s551_s20, 32, %s822_s6, [#allocation3]  }
 0x640   :  { %712 = dma.done.wait [#allocation3], 32  }
 0x641   :  { %713 = vsyncadd [#allocation3], 4294967264 }
 0x642   :  { %557 = vsyncpa [#allocation3], 1 }

</bundles_post_ra>
